<compile_context>
chip_gen: v7x
topology: tpu7x:2x2x1
jax: 0.10.0
libtpu: 0.0.40
codegen_flags: <defaults>
</compile_context>

<pallas_src>
import functools

import jax
import jax.numpy as jnp
from jax import lax
from jax.experimental import pallas as pl
from jax.experimental.pallas import tpu as pltpu

BN_EPS = 1e-5


def _round_up(x, m):
    return (x + m - 1) // m * m


def _stats_kernel(tap_ref, w_ref, stats_ref):
    """Pass 1: per-(batch, tile) partial sum / sum-of-squares of the bias-free conv output.

    tap_ref: (1, 3*C_in, TN) stacked taps (row k*C_in+ci = x_pad[ci, s*j + k]); padded lanes
             are exactly zero, so they contribute nothing to the sums (no masking needed).
    w_ref:   (C_out, 3*C_in); stats_ref: (1, 1, C_out, 2).
    """
    y = jnp.dot(w_ref[...], tap_ref[0], preferred_element_type=jnp.float32)   # (C_out, TN) f32
    s1 = jnp.sum(y, axis=1, keepdims=True)                                    # (C_out, 1)
    s2 = jnp.sum(y * y, axis=1, keepdims=True)                                # (C_out, 1)
    stats_ref[0, 0] = jnp.concatenate([s1, s2], axis=1)                       # (C_out, 2)


def _apply_kernel(tap_ref, w_ref, scale_ref, shift_ref, o_ref):
    """Pass 2: recompute conv tile, apply folded BN (scale/shift) + ReLU, lane-dense store."""
    y = jnp.dot(w_ref[...], tap_ref[0], preferred_element_type=jnp.float32)   # (C_out, TN) f32
    o_ref[0] = jnp.maximum(y * scale_ref[...] + shift_ref[...], 0.0).astype(o_ref.dtype)


def downsample(x, weight, bias, gamma, beta, reduction_ratio=2, tile_n=1024,
               compute_dtype=jnp.bfloat16):
    """x: (B, C_in, N); weight: (C_out, C_in, 3); returns (B, C_out, N_out) float32.

    `bias` is accepted for API parity with nn.Conv1d but cancels exactly under
    training-mode BatchNorm (the per-channel mean subtracts it), so it is unused.
    """
    del bias  # mathematically cancelled by train-mode BN
    x = x.astype(jnp.float32)
    weight = weight.astype(jnp.float32)
    gamma = gamma.astype(jnp.float32)
    beta = beta.astype(jnp.float32)

    B, C_in, N = x.shape
    C_out = weight.shape[0]
    s = int(reduction_ratio)
    # Conv1d output length with kernel=3, padding=1, stride=s.
    N_out = (N + 2 * 1 - 3) // s + 1

    # --- tile the output-position axis (lane axis) ---
    TN = min(max(int(tile_n), 128), _round_up(N_out, 128))
    TN = _round_up(TN, 128)
    num_tiles = pl.cdiv(N_out, TN)
    NP = num_tiles * TN

    # --- wrapper glue: one stacked tap array (B, 3*C_in, NP), lane axis = output position ---
    # Row order k*C_in + ci matches w2d below.  Padded lanes are exactly zero (no bias in
    # kernel) so pass-1 sums are correct without any in-kernel masking.
    x_pad = jnp.pad(x, ((0, 0), (0, 0), (1, 1)))                               # (B, C_in, N+2)
    taps = jnp.concatenate(
        [x_pad[:, :, k:k + s * (N_out - 1) + 1:s] for k in range(3)], axis=1)  # (B, 3*C_in, N_out)
    taps = jnp.pad(taps, ((0, 0), (0, 0), (0, NP - N_out))).astype(compute_dtype)

    # w2d[co, k*C_in + ci] = weight[co, ci, k]
    w2d = jnp.transpose(weight, (0, 2, 1)).reshape(C_out, 3 * C_in).astype(compute_dtype)

    grid = (B, num_tiles)
    tap_spec = pl.BlockSpec((1, 3 * C_in, TN), lambda b, t: (b, 0, t))
    w_spec = pl.BlockSpec((C_out, 3 * C_in), lambda b, t: (0, 0))
    vec_spec = pl.BlockSpec((C_out, 1), lambda b, t: (0, 0))

    itemsize = jnp.dtype(compute_dtype).itemsize
    flops = 2 * B * NP * (3 * C_in) * C_out
    tap_bytes = itemsize * B * 3 * C_in * NP
    w_bytes = itemsize * C_out * 3 * C_in

    # ---- pass 1: per-(batch, tile) partial BN statistics; both grid axes parallel ----
    stats = pl.pallas_call(
        _stats_kernel,
        out_shape=jax.ShapeDtypeStruct((B, num_tiles, C_out, 2), jnp.float32),
        grid=grid,
        in_specs=[tap_spec, w_spec],
        out_specs=pl.BlockSpec((1, 1, C_out, 2), lambda b, t: (b, t, 0, 0)),
        compiler_params=pltpu.CompilerParams(
            dimension_semantics=("parallel", "parallel")),
        cost_estimate=pl.CostEstimate(
            flops=flops, transcendentals=0,
            bytes_accessed=tap_bytes + w_bytes + 4 * B * num_tiles * C_out * 2),
    )(taps, w2d)

    # tiny cross-(batch, tile) combine + fold BN into per-channel scale/shift (plain JAX, f32)
    count = float(B * N_out)
    s1 = jnp.sum(stats[..., 0], axis=(0, 1))                                   # (C_out,)
    s2 = jnp.sum(stats[..., 1], axis=(0, 1))
    mean = s1 / count                                                          # mean of bias-free conv
    var = jnp.maximum(s2 / count - mean * mean, 0.0)                           # biased var (train mode)
    inv_std = lax.rsqrt(var + BN_EPS)
    scale = gamma * inv_std
    shift = beta - mean * scale

    # ---- pass 2: conv + folded BN + ReLU; exact (B, C_out, N_out) output, no trailing slice ----
    out = pl.pallas_call(
        _apply_kernel,
        out_shape=jax.ShapeDtypeStruct((B, C_out, N_out), jnp.float32),
        grid=grid,
        in_specs=[tap_spec, w_spec, vec_spec, vec_spec],
        out_specs=pl.BlockSpec((1, C_out, TN), lambda b, t: (b, 0, t)),
        compiler_params=pltpu.CompilerParams(
            dimension_semantics=("parallel", "parallel")),
        cost_estimate=pl.CostEstimate(
            flops=flops, transcendentals=0,
            bytes_accessed=tap_bytes + w_bytes + 4 * B * C_out * N_out),
    )(taps, w2d, scale.reshape(C_out, 1), shift.reshape(C_out, 1))

    return out


def _reference(x, weight, bias, gamma, beta, reduction_ratio=2):
    """Pure-JAX reference reproducing the PyTorch forward (training-mode BN)."""
    y = lax.conv_general_dilated(
        x, weight, window_strides=(reduction_ratio,), padding=((1, 1),),
        dimension_numbers=("NCH", "OIH", "NCH"))
    y = y + bias[None, :, None]
    mean = jnp.mean(y, axis=(0, 2), keepdims=True)
    var = jnp.mean((y - mean) ** 2, axis=(0, 2), keepdims=True)
    y = (y - mean) * lax.rsqrt(var + BN_EPS)
    y = y * gamma[None, :, None] + beta[None, :, None]
    return jnp.maximum(y, 0.0)


if __name__ == "__main__":
    B, C_in, N = 2, 4, 16
    C_out, reduction_ratio = 8, 2

    key = jax.random.PRNGKey(0)
    kx, kw, kb, kg, kbe = jax.random.split(key, 5)
    x = jax.random.normal(kx, (B, C_in, N), dtype=jnp.float32)
    weight = 0.1 * jax.random.normal(kw, (C_out, C_in, 3), dtype=jnp.float32)
    bias = 0.1 * jax.random.normal(kb, (C_out,), dtype=jnp.float32)
    gamma = 1.0 + 0.1 * jax.random.normal(kg, (C_out,), dtype=jnp.float32)
    beta = 0.1 * jax.random.normal(kbe, (C_out,), dtype=jnp.float32)

    ref = jax.block_until_ready(_reference(x, weight, bias, gamma, beta, reduction_ratio))

    # f32 path: tight check against the reference.
    out_f32 = jax.block_until_ready(
        downsample(x, weight, bias, gamma, beta, reduction_ratio, compute_dtype=jnp.float32))
    assert out_f32.shape == (B, C_out, N // reduction_ratio), out_f32.shape
    assert jnp.allclose(out_f32, ref, atol=5e-4, rtol=5e-4), \
        float(jnp.max(jnp.abs(out_f32 - ref)))

    # bf16 tap/weight path (default, halves the dominant HBM stream): looser tolerance.
    out_bf16 = jax.block_until_ready(
        downsample(x, weight, bias, gamma, beta, reduction_ratio))
    assert out_bf16.shape == (B, C_out, N // reduction_ratio), out_bf16.shape
    assert jnp.allclose(out_bf16, ref, atol=5e-2, rtol=5e-2), \
        float(jnp.max(jnp.abs(out_bf16 - ref)))

    print("KERNEL_OK")
</pallas_src>

<mosaic_0001>
module attributes {stable_mosaic.version = 11 : i64} {
  func.func @_stats_kernel(%arg0: i32, %arg1: i32, %arg2: memref<1x12x128xf32, #tpu.memory_space<vmem>>, %arg3: memref<8x12xf32, #tpu.memory_space<vmem>>, %arg4: memref<1x1x8x2xf32, #tpu.memory_space<vmem>>) attributes {dimension_semantics = [#tpu.dimension_semantics<parallel>, #tpu.dimension_semantics<parallel>], iteration_bounds = array<i64: 2, 1>, scalar_prefetch = 0 : i64, scratch_operands = 0 : i64, tpu.core_type = #tpu.core_type<tc>, window_params = [{transform_indices = @transform_0, window_bounds = array<i64: 1, 12, 128>}, {pipeline_mode = #tpu.pipeline_mode<synchronous>, transform_indices = @transform_1, window_bounds = array<i64: 8, 12>}, {transform_indices = @transform_2, window_bounds = array<i64: 1, 1, 8, 2>}]} {
    %c0 = arith.constant 0 : index
    %c0_0 = arith.constant 0 : index
    %0 = vector.load %arg3[%c0, %c0_0] : memref<8x12xf32, #tpu.memory_space<vmem>>, vector<8x12xf32>
    %c0_1 = arith.constant 0 : index
    %c0_2 = arith.constant 0 : index
    %c0_3 = arith.constant 0 : index
    %1 = vector.load %arg2[%c0_1, %c0_2, %c0_3] : memref<1x12x128xf32, #tpu.memory_space<vmem>>, vector<1x12x128xf32>
    %2 = vector.shape_cast %1 : vector<1x12x128xf32> to vector<12x128xf32>
    %cst = arith.constant dense<0.000000e+00> : vector<8x128xf32>
    %3 = tpu.matmul %0, %2, %cst {dimension_numbers = #tpu.dot_dimension_numbers<[1], [0], [0], [1], [0, 0, 1, 1], [], []>} : vector<8x12xf32>, vector<12x128xf32>, vector<8x128xf32> -> vector<8x128xf32>
    %cst_4 = arith.constant dense<0.000000e+00> : vector<8xf32>
    %4 = vector.multi_reduction <add>, %3, %cst_4 [1] : vector<8x128xf32> to vector<8xf32>
    %5 = vector.shape_cast %4 : vector<8xf32> to vector<8x1xf32>
    %6 = arith.mulf %3, %3 : vector<8x128xf32>
    %cst_5 = arith.constant dense<0.000000e+00> : vector<8xf32>
    %7 = vector.multi_reduction <add>, %6, %cst_5 [1] : vector<8x128xf32> to vector<8xf32>
    %8 = vector.shape_cast %7 : vector<8xf32> to vector<8x1xf32>
    %9 = tpu.concatenate %5, %8 in 1 : vector<8x1xf32>, vector<8x1xf32> -> vector<8x2xf32>
    %c0_6 = arith.constant 0 : index
    %c0_7 = arith.constant 0 : index
    %c0_8 = arith.constant 0 : index
    %c0_9 = arith.constant 0 : index
    %10 = vector.load %arg4[%c0_6, %c0_7, %c0_8, %c0_9] : memref<1x1x8x2xf32, #tpu.memory_space<vmem>>, vector<1x1x8x2xf32>
    %11 = vector.shape_cast %10 : vector<1x1x8x2xf32> to vector<8x2xf32>
    %12 = vector.shape_cast %9 : vector<8x2xf32> to vector<1x1x8x2xf32>
    tpu.vector_store %arg4[%c0_6, %c0_7, %c0_8, %c0_9], %12 {strides = array<i32>} : memref<1x1x8x2xf32, #tpu.memory_space<vmem>>, vector<1x1x8x2xf32>,
    return
  }
  func.func @transform_0(%arg0: i32, %arg1: i32) -> (i32, i32, i32) {
    %c0_i32 = arith.constant 0 : i32
    %c0_i32_0 = arith.constant 0 : i32
    return %arg0, %c0_i32, %arg1 : i32, i32, i32
  }
  func.func @transform_1(%arg0: i32, %arg1: i32) -> (i32, i32) {
    %c0_i32 = arith.constant 0 : i32
    %c0_i32_0 = arith.constant 0 : i32
    %c0_i32_1 = arith.constant 0 : i32
    return %c0_i32, %c0_i32_0 : i32, i32
  }
  func.func @transform_2(%arg0: i32, %arg1: i32) -> (i32, i32, i32, i32) {
    %c0_i32 = arith.constant 0 : i32
    %c0_i32_0 = arith.constant 0 : i32
    %c0_i32_1 = arith.constant 0 : i32
    return %arg0, %arg1, %c0_i32, %c0_i32_0 : i32, i32, i32, i32
  }
}

</mosaic_0001>

<bundles_post_ra>
// kernel: tpu_custom_call.1
= control target key start
LH: loop header
LB: loop body
LE: loop exit
PB: predicated region body
PF: predicated region fallthrough
CT: control target
= control target key end

     0   :  { %s438_s9 = smov 0   ;;  %s440_s10 = smov 0   ;;  %s474_s0 = inlined_call_operand.vmem [shape: f32[2,12,128], index: 0, kind: input, shape index: {}]   ;;  %s475_s1 = inlined_call_operand.vmem [shape: f32[8,12], index: 1, kind: input, shape index: {}]   ;;  %s476_s2 = inlined_call_operand.vmem [shape: f32[2,1,8,2], index: 2, kind: output, shape index: {}]  }
   0x1   :  { %s442_s11 = smov 0  }
   0x2 LB: > { %s24_s12 = sadd.s32 1, %s413_s10  ;;  %p344_p0 = scmp.ge.s32.totalorder %s417_s11, 1  ;;  %s417_s11 = sphi %s442_s11, %s12_s11   ;;  %s413_s10 = sphi %s440_s10, %s478_s10   ;;  %s409_s9 = sphi %s438_s9, %s477_s9  }
   0x3   : > { %p26_p1 = scmp.ge.s32.totalorder %s24_s12, 2  ;;  %p131_p2 = scmp.lt.s32.totalorder %s417_s11, 3 }
   0x5   : > { %s480_s12 = smov (%p26_p1, %s24_s12), 0  ;;  %p132_p3 = pnand %p344_p0, %p131_p2 }
   0x6   : > { %p158_p4 = scmp.lt.s32.totalorder (!%p132_p3), %s409_s9, 1  ;;  %v419_v0 = vmov (!%p132_p3), 0.0|0.0   ;;  %vm420_vm0 = vmmov (!%p132_p3), 0   ;;  %v421_v1 = vmov (!%p132_p3), 0.0   ;;  %vm180_vm1 = vcmask (!%p132_p3), 1043456   ;;  %v173_v5 = vld [vmem:[%s475_s1] sm:$0xff] (!%p132_p3) }
   0x7   : > { %135 = sbr.rel (%p132_p3) target bundleno = 383 (0x17f), region = 28  ;;  %363 = vmatprep.subr.bf16.mxu0 (!%p132_p3), %v419_v0  ;;  %360 = vmatprep.mubr.msk.f32.mxu0 (!%p132_p3), %vm420_vm0, %v421_v1  ;;  %vm422_vm2 = vmmov (!%p132_p3), 1   ;;  %vm176_vm4 = vcmask (!%p132_p3), 97280   ;;  %vm259_vm5 = vcmask (!%p132_p3), 7168   ;;  %vm261_vm6 = vcmask (!%p132_p3), 15360  }
   0x8   : > { %vm365_vm3 = vmpackc.low (!%p132_p3), %vm180_vm1, %vm422_vm2 }
   0xe   : > { %s482_s9 = smov (!%p158_p4, %s409_s9), 1 }
   0xf   : > { %s352_s13 = sshll.u32 %s482_s9, 4  ;;  %s347_s19 = sshll.u32 %s482_s9, 3 }
  0x10   : > { %s165_s16 = scalar_lea.vmem %s474_s0, %s352_s13  ;;  %s172_s22 = scalar_lea.vmem %s476_s2, %s347_s19 }
  0x11   : > { %v174_v2 = vld [vmem:[%s165_s16] sm:$0xff]  ;;  %v175_v3 = vld [vmem:[%s165_s16 + $0x8] sm:$0xf] }
  0x12   : > { %v364_v4 = vpack.c.bf16 %v175_v3, %v174_v2 }
  0x14   : > { %366 = vmatpush3.bf16.msk.msra.mxu0 %vm365_vm3, %v364_v4 }
  0x17   : > { %361 = vmatmul.mubr.msk.f32.vlgmr.msra.gmra.mrb[0].mxu0 %vm176_vm4, %v173_v5 }
  0xea   : > { %v250_v6 = vpop.f32.mrb[0].mxu0 }
  0xeb   : > { %254 = vadd.xlane.f32.xlu0 %v250_v6  ;;  %v362_v7 = vpop.f32.mrb[1].mxu0  ;;  %v256_v8 = vmul.f32 %v250_v6, %v250_v6 }
  0xef   : > { %257 = vadd.xlane.f32.xlu0 %v256_v8 }
 0x178   : > { %v255_v9 = vpop.xlane.xlu0 %254 }
 0x17c   : > { %v258_v10 = vpop.xlane.xlu0 %257 }
 0x17d   : > { %v260_v11 = vsel %vm259_vm5, %v255_v9, %v258_v10 }
 0x17e   : > { %262 = vst.msk [vmem:[%s172_s22] sm:$0xff] %vm261_vm6, %v260_v11 }
 0x17f PF: > { %s12_s11 = sadd.s32 1, %s417_s11   ;;  %s477_s9 = smov %s413_s10 }
 0x180   : > { %p9_p5 = scmp.ge.s32.totalorder %s12_s11, 4   ;;  %s478_s10 = smov %s480_s12 }
 0x182   :  { %11 = sbr.rel (!%p9_p5) target bundleno = 2 (0x2), region = 58 }

</bundles_post_ra>
